<compile_context>
chip_gen: v7x
topology: tpu7x:2x2x1
jax: 0.10.0
libtpu: 0.0.40
codegen_flags: <defaults>
</compile_context>

<pallas_src>
import jax
import jax.numpy as jnp
from jax.experimental import pallas as pl
from jax.experimental.pallas import tpu as pltpu

_LANE = 128


# --------------------------------------------------------------------------- #
# One-time hardware / capability probes (cached; keeps the hot path clean)     #
# --------------------------------------------------------------------------- #
_MEM_PARAMS = None          # (target_block_bytes, vmem_limit_bytes)
_PRNG_SUPPORTED = None      # bool


def _mem_params():
    """Generation-aware block-size target and scoped-VMEM limit."""
    global _MEM_PARAMS
    if _MEM_PARAMS is None:
        vmem = None
        try:
            vmem = int(pltpu.get_tpu_info().vmem_capacity_bytes)
        except Exception:
            vmem = None
        if vmem is not None and vmem >= 100 * 2**20:
            # v5e / v6e: 128 MiB VMEM, single TensorCore -> bigger blocks.
            _MEM_PARAMS = (8 * 2**20, 96 * 2**20)
        else:
            # v7x-safe defaults (64 MiB physical VMEM per TC); fine everywhere.
            _MEM_PARAMS = (4 * 2**20, 48 * 2**20)
    return _MEM_PARAMS


def _stateful_prng_supported():
    """Probe the stateful-PRNG lowering once; pick the kernel path statically."""
    global _PRNG_SUPPORTED
    if _PRNG_SUPPORTED is None:
        def _probe(o_ref):
            pltpu.prng_seed(jnp.int32(0))
            o_ref[...] = pltpu.stateful_normal(o_ref.shape, jnp.float32)
        try:
            out = pl.pallas_call(
                _probe, out_shape=jax.ShapeDtypeStruct((8, _LANE), jnp.float32))()
            jax.block_until_ready(out)
            _PRNG_SUPPORTED = True
        except Exception:
            _PRNG_SUPPORTED = False
    return _PRNG_SUPPORTED


# --------------------------------------------------------------------------- #
# Kernels                                                                     #
# --------------------------------------------------------------------------- #
def _seed_block_prng(seed_ref):
    """Distinct, hashed PRNG stream per grid step (avoids adjacent-seed reuse)."""
    block_id = pl.program_id(0) * pl.num_programs(1) + pl.program_id(1)
    mixed = (seed_ref[0] * jnp.int32(668265261)
             + block_id * jnp.int32(374761393)
             + jnp.int32(1013904223))            # int32 wraparound mix
    pltpu.prng_seed(mixed)


def _fma_store(x_ref, n, w_ref, o_ref):
    """o = x + n * w.  n: (nb,1,hw) f32, w: (1,C,1) f32, x/o: (nb,C,hw)."""
    x = x_ref[...]
    nw = n * w_ref[...]                          # broadcast FMA, fp32 (pure VPU)
    if o_ref.dtype == jnp.float32:
        o_ref[...] = x + nw
    else:
        # Keep x in its native dtype (bf16 VPU on v6e/v7x); only n*w is fp32.
        o_ref[...] = x + nw.astype(o_ref.dtype)


def _learned_noise_prng_kernel(seed_ref, x_ref, w_ref, o_ref):
    """Default path: noise drawn on-chip, only the output is written to HBM."""
    _seed_block_prng(seed_ref)
    nb, _, hw_t = x_ref.shape
    n = pltpu.stateful_normal((nb, 1, hw_t), jnp.float32)
    _fma_store(x_ref, n, w_ref, o_ref)


def _learned_noise_prng_noise_kernel(seed_ref, x_ref, w_ref, o_ref, noise_ref):
    """Debug/backward path: additionally writes the fp32 noise it used."""
    _seed_block_prng(seed_ref)
    nb, _, hw_t = x_ref.shape
    n = pltpu.stateful_normal((nb, 1, hw_t), jnp.float32)
    noise_ref[...] = n
    _fma_store(x_ref, n, w_ref, o_ref)


def _learned_noise_precomputed_kernel(x_ref, n_ref, w_ref, o_ref):
    """Fallback path: noise precomputed by XLA, streamed in lane-dense."""
    _fma_store(x_ref, n_ref[...], w_ref, o_ref)


# --------------------------------------------------------------------------- #
# Tiling heuristics                                                           #
# --------------------------------------------------------------------------- #
def _choose_tiles(N, C, HW, itemsize, target_bytes):
    """Pick (batch_tile, hw_tile): lane-dense, a few MiB per (VMEM-padded) block."""
    sublane = max(1, 32 // itemsize)          # (8,128) f32 tiling, (16,128) bf16, ...
    c_pad = -(-C // sublane) * sublane        # sublane padding of the C axis in VMEM
    bytes_per_hw = c_pad * itemsize

    max_hw = max(_LANE, target_bytes // bytes_per_hw)
    if HW <= max_hw:
        hw_t = HW                             # block == full dim: always legal, lane-dense
    else:
        cap = (max_hw // _LANE) * _LANE       # 128-multiple cap -> unmasked vst
        hw_t = cap
        t = cap
        while t >= max(_LANE, cap // 2):      # prefer an exact divisor near the cap
            if HW % t == 0:
                hw_t = t
                break
            t -= _LANE
        # otherwise: ragged last block handled by the cdiv grid (elementwise-safe)

    per_batch = c_pad * hw_t * itemsize
    nb = int(min(N, max(1, target_bytes // per_batch)))
    t = nb
    while t >= max(1, nb // 2):               # prefer an exact divisor of N
        if N % t == 0:
            nb = t
            break
        t -= 1
    return nb, hw_t


# --------------------------------------------------------------------------- #
# pallas_call wrappers                                                        #
# --------------------------------------------------------------------------- #
def _call_prng(x2, w2, seed_arr, nb, hw_t, vmem_limit, *, return_noise, donate_input):
    N, C, HW = x2.shape
    grid = (pl.cdiv(N, nb), pl.cdiv(HW, hw_t))
    x_spec = pl.BlockSpec((nb, C, hw_t), lambda i, j, seed: (i, 0, j))
    w_spec = pl.BlockSpec((1, C, 1), lambda i, j, seed: (0, 0, 0))   # resident
    o_spec = pl.BlockSpec((nb, C, hw_t), lambda i, j, seed: (i, 0, j))

    if return_noise:
        kernel = _learned_noise_prng_noise_kernel
        out_shape = (jax.ShapeDtypeStruct((N, C, HW), x2.dtype),
                     jax.ShapeDtypeStruct((N, 1, HW), jnp.float32))
        out_specs = [o_spec, pl.BlockSpec((nb, 1, hw_t), lambda i, j, seed: (i, 0, j))]
    else:
        kernel = _learned_noise_prng_kernel
        out_shape = jax.ShapeDtypeStruct((N, C, HW), x2.dtype)
        out_specs = o_spec

    # input_output_aliases indices count every call operand (incl. the
    # scalar-prefetch seed), so x2 is operand 1.
    aliases = {1: 0} if donate_input else {}

    return pl.pallas_call(
        kernel,
        out_shape=out_shape,
        grid_spec=pltpu.PrefetchScalarGridSpec(
            num_scalar_prefetch=1,
            grid=grid,
            in_specs=[x_spec, w_spec],
            out_specs=out_specs,
        ),
        compiler_params=pltpu.CompilerParams(
            dimension_semantics=("parallel", "parallel"),
            vmem_limit_bytes=vmem_limit,
        ),
        input_output_aliases=aliases,
    )(seed_arr, x2, w2)


def _call_precomputed(x2, noise2, w2, nb, hw_t, vmem_limit):
    N, C, HW = x2.shape
    grid = (pl.cdiv(N, nb), pl.cdiv(HW, hw_t))
    return pl.pallas_call(
        _learned_noise_precomputed_kernel,
        out_shape=jax.ShapeDtypeStruct((N, C, HW), x2.dtype),
        grid_spec=pltpu.PrefetchScalarGridSpec(
            num_scalar_prefetch=0,
            grid=grid,
            in_specs=[
                pl.BlockSpec((nb, C, hw_t), lambda i, j: (i, 0, j)),
                pl.BlockSpec((nb, 1, hw_t), lambda i, j: (i, 0, j)),
                pl.BlockSpec((1, C, 1), lambda i, j: (0, 0, 0)),
            ],
            out_specs=pl.BlockSpec((nb, C, hw_t), lambda i, j: (i, 0, j)),
        ),
        compiler_params=pltpu.CompilerParams(
            dimension_semantics=("parallel", "parallel"),
            vmem_limit_bytes=vmem_limit,
        ),
    )(x2, noise2, w2)


# --------------------------------------------------------------------------- #
# Public forward                                                              #
# --------------------------------------------------------------------------- #
def learned_noise(inputs, weight, seed=0, *, return_noise=False, donate_input=False):
    """LearnedNoise forward.  inputs: (N, C, H, W); weight: (1, C, 1, 1).

    Returns outputs = inputs + noise * weight, with noise ~ N(0,1) of logical
    shape (N, 1, H, W) broadcast over channels.  With return_noise=True also
    returns the fp32 noise tensor (extra HBM write; off by default).
    """
    N, C, H, W = inputs.shape
    HW = H * W
    itemsize = jnp.dtype(inputs.dtype).itemsize
    target_bytes, vmem_limit = _mem_params()
    nb, hw_t = _choose_tiles(N, C, HW, itemsize, target_bytes)

    x2 = inputs.reshape(N, C, HW)                       # lane-dense: last dim = H*W
    w2 = weight.reshape(1, C, 1).astype(jnp.float32)    # resident per-channel scale

    if _stateful_prng_supported():
        seed_arr = jnp.asarray([seed], dtype=jnp.int32)
        res = _call_prng(x2, w2, seed_arr, nb, hw_t, vmem_limit,
                         return_noise=return_noise, donate_input=donate_input)
        if return_noise:
            out2, noise2 = res
            return out2.reshape(N, C, H, W), noise2.reshape(N, 1, H, W)
        return res.reshape(N, C, H, W)

    # Statically selected fallback (stateful PRNG lowering unavailable):
    # TODO(synk): fallback uses jax.random, so its noise stream differs from the
    # in-kernel hardware-PRNG stream (both are N(0,1)).
    noise2 = jax.random.normal(jax.random.PRNGKey(seed), (N, 1, HW), dtype=jnp.float32)
    out2 = _call_precomputed(x2, noise2, w2, nb, hw_t, vmem_limit)
    if return_noise:
        return out2.reshape(N, C, H, W), noise2.reshape(N, 1, H, W)
    return out2.reshape(N, C, H, W)


if __name__ == "__main__":
    key = jax.random.PRNGKey(0)
    k_x, k_w = jax.random.split(key)

    N, C, H, W = 2, 4, 16, 16
    x = jax.random.normal(k_x, (N, C, H, W), dtype=jnp.float32)

    # Module __init__ zero-initializes weight -> output must equal input.
    w0 = jnp.zeros((1, C, 1, 1), dtype=jnp.float32)
    out0 = jax.block_until_ready(learned_noise(x, w0, seed=0))
    assert out0.shape == (N, C, H, W)
    assert jnp.allclose(out0, x, atol=1e-6), "zero-weight output must equal input"

    # Nonzero weight: the default (no-noise-output) path must match the debug
    # path that also returns the noise it used, and satisfy out = x + noise*w.
    w1 = jax.random.normal(k_w, (1, C, 1, 1), dtype=jnp.float32)
    out_a = learned_noise(x, w1, seed=123)
    out_b, noise_b = learned_noise(x, w1, seed=123, return_noise=True)
    out_a, out_b, noise_b = jax.block_until_ready((out_a, out_b, noise_b))
    assert noise_b.shape == (N, 1, H, W)
    ref = x + noise_b * w1
    assert jnp.allclose(out_b, ref, atol=1e-5), "broadcast FMA mismatch"
    assert jnp.allclose(out_a, out_b, atol=1e-6), "default path diverged from debug path"

    # Loose sanity check that the noise is actually standard normal.
    std = float(jnp.std(noise_b))
    mean = float(jnp.mean(noise_b))
    assert 0.5 < std < 2.0 and abs(mean) < 0.5, f"bad noise stats: mean={mean}, std={std}"

    print("KERNEL_OK")
</pallas_src>

<mosaic_0001>
module attributes {stable_mosaic.version = 11 : i64} {
  func.func @_learned_noise_precomputed_kernel(%arg0: i32, %arg1: i32, %arg2: memref<2x4x256xf32, #tpu.memory_space<vmem>>, %arg3: memref<2x1x256xf32, #tpu.memory_space<vmem>>, %arg4: memref<1x4x1xf32, #tpu.memory_space<vmem>>, %arg5: memref<2x4x256xf32, #tpu.memory_space<vmem>>) attributes {dimension_semantics = [#tpu.dimension_semantics<parallel>, #tpu.dimension_semantics<parallel>], iteration_bounds = array<i64: 1, 1>, scalar_prefetch = 0 : i64, scratch_operands = 0 : i64, tpu.core_type = #tpu.core_type<tc>, window_params = [{transform_indices = @transform_0, window_bounds = array<i64: 2, 4, 256>}, {transform_indices = @transform_1, window_bounds = array<i64: 2, 1, 256>}, {pipeline_mode = #tpu.pipeline_mode<synchronous>, transform_indices = @transform_2, window_bounds = array<i64: 1, 4, 1>}, {transform_indices = @transform_3, window_bounds = array<i64: 2, 4, 256>}]} {
    %c0 = arith.constant 0 : index
    %c0_0 = arith.constant 0 : index
    %c0_1 = arith.constant 0 : index
    %0 = vector.load %arg3[%c0, %c0_0, %c0_1] : memref<2x1x256xf32, #tpu.memory_space<vmem>>, vector<2x1x256xf32>
    %c0_2 = arith.constant 0 : index
    %c0_3 = arith.constant 0 : index
    %c0_4 = arith.constant 0 : index
    %1 = vector.load %arg2[%c0_2, %c0_3, %c0_4] : memref<2x4x256xf32, #tpu.memory_space<vmem>>, vector<2x4x256xf32>
    %c0_5 = arith.constant 0 : index
    %c0_6 = arith.constant 0 : index
    %c0_7 = arith.constant 0 : index
    %2 = vector.load %arg4[%c0_5, %c0_6, %c0_7] : memref<1x4x1xf32, #tpu.memory_space<vmem>>, vector<1x4x1xf32>
    %3 = vector.broadcast %0 : vector<2x1x256xf32> to vector<2x4x256xf32>
    %4 = vector.broadcast %2 : vector<1x4x1xf32> to vector<2x4x256xf32>
    %5 = arith.mulf %3, %4 : vector<2x4x256xf32>
    %6 = arith.addf %1, %5 : vector<2x4x256xf32>
    %c0_8 = arith.constant 0 : index
    %c0_9 = arith.constant 0 : index
    %c0_10 = arith.constant 0 : index
    %7 = vector.load %arg5[%c0_8, %c0_9, %c0_10] : memref<2x4x256xf32, #tpu.memory_space<vmem>>, vector<2x4x256xf32>
    tpu.vector_store %arg5[%c0_8, %c0_9, %c0_10], %6 {strides = array<i32>} : memref<2x4x256xf32, #tpu.memory_space<vmem>>, vector<2x4x256xf32>,
    return
  }
  func.func @transform_0(%arg0: i32, %arg1: i32) -> (i32, i32, i32) {
    %c0_i32 = arith.constant 0 : i32
    %c0_i32_0 = arith.constant 0 : i32
    return %arg0, %c0_i32, %arg1 : i32, i32, i32
  }
  func.func @transform_1(%arg0: i32, %arg1: i32) -> (i32, i32, i32) {
    %c0_i32 = arith.constant 0 : i32
    %c0_i32_0 = arith.constant 0 : i32
    return %arg0, %c0_i32, %arg1 : i32, i32, i32
  }
  func.func @transform_2(%arg0: i32, %arg1: i32) -> (i32, i32, i32) {
    %c0_i32 = arith.constant 0 : i32
    %c0_i32_0 = arith.constant 0 : i32
    %c0_i32_1 = arith.constant 0 : i32
    %c0_i32_2 = arith.constant 0 : i32
    return %c0_i32, %c0_i32_0, %c0_i32_1 : i32, i32, i32
  }
  func.func @transform_3(%arg0: i32, %arg1: i32) -> (i32, i32, i32) {
    %c0_i32 = arith.constant 0 : i32
    %c0_i32_0 = arith.constant 0 : i32
    return %arg0, %c0_i32, %arg1 : i32, i32, i32
  }
}

</mosaic_0001>

<bundles_post_ra>
// kernel: tpu_custom_call.1
= control target key start
LH: loop header
LB: loop body
LE: loop exit
PB: predicated region body
PF: predicated region fallthrough
CT: control target
= control target key end

     0   :  { %8 = vsyncpa [#allocation3], 0  ;;  %s212_s0 = inlined_call_operand.hbm [shape: f32[2,4,256], index: 0, kind: input, shape index: {}]   ;;  %s213_s1 = inlined_call_operand.vmem [shape: f32[2,1,256], index: 1, kind: input, shape index: {}]   ;;  %s214_s2 = inlined_call_operand.vmem [shape: f32[1,4,1], index: 2, kind: input, shape index: {}]   ;;  %s215_s3 = inlined_call_operand.hbm [shape: f32[2,4,256], index: 3, kind: output, shape index: {}]  }
   0x1   :  { %9 = vsyncpa [#allocation4], 0  ;;  %s148_s12 = smov [#allocation2]   ;;  %s100_s16 = scalar_lea.hbm %s212_s0, 256 }
   0x2   :  { %s15_s13 = sshll.u32 %s148_s12, 4  ;;  %p101_p0 = scmp.ne.s32.totalorder %s212_s0, %s100_s16  ;;  %s16_s13 = int_to_ptr.vmem [resolvable:$true] %s15_s13 }
   0x3   :  { %p104_p1 = scmp.lt.u32.totalorder %s100_s16, %s212_s0 }
   0x5   :  { %p106_p2 = pnand %p104_p1, %p101_p0 }
   0x7   :  { %109 = shalt.err (!%p106_p2)
}
   0x8   :  { %s110_s21 = scalar_lea.vmem %s16_s13, 256  ;;  %p115_p4 = scmp.lt.s32.totalorder %s16_s13, %s16_s13 }
   0x9   :  { %p111_p3 = scmp.ne.s32.totalorder %s16_s13, %s110_s21  ;;  %p116_p5 = scmp.lt.s32.totalorder %s110_s21, %s110_s21 }
   0xb   :  { %p117_p6 = por %p116_p5, %p115_p4 }
   0xd   :  { %p118_p7 = pnand %p117_p6, %p111_p3 }
   0xf   :  { %121 = shalt.err (!%p118_p7)
}
  0x10   :  { %s149_s22 = smov 128   ;;  %s150_s23 = smov 8  }
  0x11   :  { %21 = dma.hbm_to_vmem [thread:$0]  %s212_s0, 256, %s16_s13, [#allocation3], %s149_s22, %s149_s22, %s150_s23  }
  0x12   :  { %144 = dma.done.wait [#allocation3], 256  }
  0x13   :  { %145 = vsyncadd [#allocation3], 4294967040  ;;  %v151_v0 = vmov 0   ;;  %v33_v1 = vld [vmem:[%s214_s2] sm:$0xf]  ;;  %v36_v2 = vlaneseq  ;;  %v32_v18 = vld [vmem:[#allocation2 + $0x8] sm:$0xff] }
  0x14   :  { %99 = vset.pattern.permute.xlu0 %v151_v0  ;;  %v29_v6 = vld [vmem:[%s213_s1] sm:$0x3]  ;;  %v30_v7 = vld [vmem:[%s213_s1 + $0x2] sm:$0x3]  ;;  %s152_s0 = smov [#allocation5]  }
  0x15   :  { %58 = vperm.xlu0 %99, %v33_v1   ;;  %v37_v3 = vshrl.u32 %v36_v2, 7  ;;  %v31_v17 = vld [vmem:[#allocation2] sm:$0xff]  ;;  %s82_s2 = sshll.u32 %s152_s0, 4  ;;  %s83_s2 = int_to_ptr.vmem [resolvable:$true] %s82_s2 }
  0x16   :  { %s122_s1 = scalar_lea.vmem %s83_s2, 256  ;;  %p127_p9 = scmp.lt.s32.totalorder %s83_s2, %s83_s2 }
  0x17   :  { %v38_v4 = vsub.s32 0, %v37_v3  ;;  %v42_v5 = vsub.s32 1, %v37_v3  ;;  %p123_p8 = scmp.ne.s32.totalorder %s83_s2, %s122_s1  ;;  %p128_p10 = scmp.lt.s32.totalorder %s122_s1, %s122_s1 }
  0x19   :  { %v39_v8 = vrot.slane %v29_v6, %v38_v4  ;;  %v43_v9 = vrot.slane %v29_v6, %v42_v5  ;;  %v47_v10 = vrot.slane %v30_v7, %v38_v4  ;;  %v51_v11 = vrot.slane %v30_v7, %v42_v5  ;;  %p129_p11 = por %p128_p10, %p127_p9 }
  0x1b   :  { %p130_p12 = pnand %p129_p11, %p123_p8 }
  0x94   :  { %v59_v12 = vpop.permute.xlu0 %58 }
  0x95   :  { %v61_v13 = vmul.f32 %v59_v12, %v39_v8  ;;  %v62_v14 = vmul.f32 %v59_v12, %v43_v9  ;;  %v63_v15 = vmul.f32 %v59_v12, %v47_v10  ;;  %v64_v16 = vmul.f32 %v59_v12, %v51_v11 }
  0x97   :  { %v69_v19 = vcombine.low %v61_v13, %v62_v14  ;;  %v70_v20 = vcombine.low %v63_v15, %v64_v16 }
  0x99   :  { %v73_v21 = vadd.f32 %v69_v19, %v31_v17  ;;  %v74_v22 = vadd.f32 %v70_v20, %v32_v18 }
  0x9b   :  { %75 = vst [vmem:[#allocation5] sm:$0xff] %v73_v21  ;;  %76 = vst [vmem:[#allocation5 + $0x8] sm:$0xff] %v74_v22 }
  0x9c   :  { %133 = shalt.err (!%p130_p12)
}
  0x9d   :  { %s134_s7 = scalar_lea.hbm %s215_s3, 256 }
  0x9e   :  { %p135_p13 = scmp.ne.s32.totalorder %s215_s3, %s134_s7  ;;  %p138_p0 = scmp.lt.u32.totalorder %s134_s7, %s215_s3 }
  0xa0   :  { %p140_p1 = pnand %p138_p0, %p135_p13 }
  0xa2   :  { %143 = shalt.err (!%p140_p1)
}
  0xa3   :  { %88 = dma.vmem_to_hbm [thread:$0]  %s83_s2, 256, %s215_s3, [#allocation4], %s149_s22, %s149_s22, %s150_s23  }
  0xa4   :  { %146 = dma.done.wait [#allocation4], 256  }
  0xa5   :  { %147 = vsyncadd [#allocation4], 4294967040 }
  0xa6   :  { %92 = vsyncpa [#allocation3], 1 }
  0xa7   :  { %93 = vsyncpa [#allocation4], 1 }

</bundles_post_ra>
